<compile_context>
chip_gen: v7x
topology: tpu7x:2x2x1
jax: 0.10.0
libtpu: 0.0.40
codegen_flags: <defaults>
</compile_context>

<pallas_src>
import jax
import jax.numpy as jnp
from jax.experimental import pallas as pl
from jax.experimental.pallas import tpu as pltpu

NEG_SLOPE = 0.01   # F.leaky_relu default
EPS = 1e-5         # nn.BatchNorm1d default
LANE = 128
MAX_L_TILE = 256   # rows per grid step (multiple of 8); full L if L <= this


def _leaky(x):
    return jnp.where(x > 0, x, NEG_SLOPE * x)


def _round_up(x, m):
    return (x + m - 1) // m * m


def residual_block_forward(x_ncl, tp):
    """x_ncl: (N, Cin, L) float32, PyTorch layout. Returns (N, Cout, L) float32."""
    N, Cin, L = x_ncl.shape
    Cout = tp["w1_t"].shape[0]
    CIP = _round_up(Cin, LANE)          # lane-padded input channels
    COP = _round_up(Cout, LANE)         # lane-padded output channels
    T = L if L <= MAX_L_TILE else MAX_L_TILE
    n_lt = (L + T - 1) // T
    L_pad = n_lt * T

    # ---- fold conv bias + BN (eval mode, running stats) into weights / shifts
    s1 = tp["g1"] / jnp.sqrt(tp["v1"] + EPS)
    sh1 = tp["b1"] * s1 + (tp["be1"] - tp["m1"] * s1)
    s2 = tp["g2"] / jnp.sqrt(tp["v2"] + EPS)
    sh2 = tp["b2"] * s2 + (tp["be2"] - tp["m2"] * s2)

    w1 = jnp.transpose(tp["w1_t"], (2, 1, 0)) * s1[None, None, :]   # (3, Cin,  Cout)
    w2 = jnp.transpose(tp["w2_t"], (2, 1, 0)) * s2[None, None, :]   # (3, Cout, Cout)
    if tp.get("wp_t") is not None:
        wp = tp["wp_t"][:, :, 0].T                                  # (Cin, Cout)
        bp = tp["bp"]
    else:  # in_channels == out_channels: identity skip connection
        wp = jnp.eye(Cin, dtype=jnp.float32)
        bp = jnp.zeros((Cout,), jnp.float32)

    def padw(w, ci, co):
        return jnp.pad(w, ((0, 0), (0, ci - w.shape[1]), (0, co - w.shape[2])))

    w1p = padw(w1, CIP, COP).astype(jnp.bfloat16)                   # (3, CIP, COP)
    w2p = padw(w2, COP, COP).astype(jnp.bfloat16)                   # (3, COP, COP)
    wpp = jnp.pad(wp, ((0, CIP - Cin), (0, COP - Cout))).astype(jnp.bfloat16)
    sh1p = jnp.pad(sh1, (0, COP - Cout)).reshape(1, COP).astype(jnp.float32)
    sh2p = jnp.pad(sh2, (0, COP - Cout)).reshape(1, COP).astype(jnp.float32)
    bpp = jnp.pad(bp, (0, COP - Cout)).reshape(1, COP).astype(jnp.float32)

    # ---- channels-last, lane-padded, halo-tiled input: (N, n_lt, T+4, CIP) bf16
    # halo of 2 rows per side (two stacked k=3 convs); global sequence edges are
    # zero rows (matches 'same' zero padding), internal tile edges carry real data.
    x_nlc = jnp.transpose(x_ncl, (0, 2, 1))
    x_padded = jnp.pad(x_nlc, ((0, 0), (2, (L_pad - L) + 2), (0, CIP - Cin)))
    x_tiles = jnp.stack(
        [x_padded[:, j * T: j * T + T + 4, :] for j in range(n_lt)],
        axis=1).astype(jnp.bfloat16)

    def kernel(x_ref, w1_ref, w2_ref, wp_ref, sh1_ref, sh2_ref, bp_ref, o_ref):
        j = pl.program_id(1)
        # conv1 (+ folded BN1 + bias) on the T+2 rows whose outputs feed conv2.
        xa = x_ref[pl.ds(0, T + 2), :]          # x[g-1]
        xb = x_ref[pl.ds(1, T + 2), :]          # x[g]
        xc = x_ref[pl.ds(2, T + 2), :]          # x[g+1]
        h = jnp.dot(xa, w1_ref[0], preferred_element_type=jnp.float32)
        h = h + jnp.dot(xb, w1_ref[1], preferred_element_type=jnp.float32)
        h = h + jnp.dot(xc, w1_ref[2], preferred_element_type=jnp.float32)
        h = _leaky(h + sh1_ref[...])
        # TODO(synk): dropout is identity (eval mode); training-mode RNG masking not implemented.
        # zero the rows that lie outside the real sequence: they are conv2's
        # 'same' zero padding (row m here is global row j*T - 1 + m).
        g = j * T - 1 + jax.lax.broadcasted_iota(jnp.int32, (T + 2, 1), 0)
        h = jnp.where((g >= 0) & (g < L), h, 0.0)
        hb = h.astype(jnp.bfloat16)
        # conv2 (+ folded BN2 + bias) producing the T output rows of this tile.
        o = jnp.dot(hb[0:T], w2_ref[0], preferred_element_type=jnp.float32)
        o = o + jnp.dot(hb[1:T + 1], w2_ref[1], preferred_element_type=jnp.float32)
        o = o + jnp.dot(hb[2:T + 2], w2_ref[2], preferred_element_type=jnp.float32)
        o = _leaky(o + sh2_ref[...])
        # 1x1 residual projection + add + final leaky_relu.
        ident = jnp.dot(x_ref[pl.ds(2, T), :], wp_ref[...],
                        preferred_element_type=jnp.float32) + bp_ref[...]
        o_ref[...] = _leaky(o + ident)

    def const_spec(a):
        nd = a.ndim
        return pl.BlockSpec(a.shape, lambda i, j, _nd=nd: (0,) * _nd)

    out = pl.pallas_call(
        kernel,
        out_shape=jax.ShapeDtypeStruct((N, L_pad, COP), jnp.float32),
        grid_spec=pltpu.PrefetchScalarGridSpec(
            num_scalar_prefetch=0,
            grid=(N, n_lt),
            in_specs=[
                pl.BlockSpec((pl.Squeezed(), pl.Squeezed(), T + 4, CIP),
                             lambda i, j: (i, j, 0, 0)),
                const_spec(w1p), const_spec(w2p), const_spec(wpp),
                const_spec(sh1p), const_spec(sh2p), const_spec(bpp),
            ],
            out_specs=pl.BlockSpec((pl.Squeezed(), T, COP),
                                   lambda i, j: (i, j, 0)),
        ),
        compiler_params=pltpu.CompilerParams(
            dimension_semantics=("parallel", "parallel"),
            vmem_limit_bytes=32 * 1024 * 1024),
    )(x_tiles, w1p, w2p, wpp, sh1p, sh2p, bpp)

    # back to PyTorch NCL layout, dropping channel / length padding.
    return jnp.transpose(out[:, :L, :Cout], (0, 2, 1))


def _reference_ncl(x_ncl, tp):
    """Plain-JAX f32 reference in PyTorch NCL layout (eval-mode BN & dropout)."""
    def conv1d(x, w, b, pad):
        y = jax.lax.conv_general_dilated(
            x, w, window_strides=(1,), padding=[(pad, pad)],
            dimension_numbers=('NCH', 'OIH', 'NCH'))
        return y + b[None, :, None]

    def bn(x, g, b, m, v):
        return (x - m[None, :, None]) / jnp.sqrt(v[None, :, None] + EPS) \
               * g[None, :, None] + b[None, :, None]

    out = _leaky(bn(conv1d(x_ncl, tp["w1_t"], tp["b1"], 1),
                    tp["g1"], tp["be1"], tp["m1"], tp["v1"]))
    out = _leaky(bn(conv1d(out, tp["w2_t"], tp["b2"], 1),
                    tp["g2"], tp["be2"], tp["m2"], tp["v2"]))
    ident = conv1d(x_ncl, tp["wp_t"], tp["bp"], 0)
    return _leaky(out + ident)


if __name__ == "__main__":
    N, Cin, Cout, L = 2, 4, 8, 16
    key = jax.random.PRNGKey(0)
    ks = jax.random.split(key, 8)

    # PyTorch-shaped parameters (deterministic synthetic init).
    w1_t = jax.random.normal(ks[0], (Cout, Cin, 3), jnp.float32) * 0.1
    b1   = jax.random.normal(ks[1], (Cout,), jnp.float32) * 0.1
    w2_t = jax.random.normal(ks[2], (Cout, Cout, 3), jnp.float32) * 0.1
    b2   = jax.random.normal(ks[3], (Cout,), jnp.float32) * 0.1
    wp_t = jax.random.normal(ks[4], (Cout, Cin, 1), jnp.float32) * 0.1
    bp   = jax.random.normal(ks[5], (Cout,), jnp.float32) * 0.1
    g1   = 1.0 + 0.1 * jax.random.normal(ks[6], (Cout,), jnp.float32)
    be1  = 0.1 * jax.random.normal(ks[7], (Cout,), jnp.float32)
    g2   = jnp.ones((Cout,), jnp.float32)
    be2  = jnp.zeros((Cout,), jnp.float32)
    m1 = jnp.zeros((Cout,), jnp.float32); v1 = jnp.ones((Cout,), jnp.float32)
    m2 = jnp.zeros((Cout,), jnp.float32); v2 = jnp.ones((Cout,), jnp.float32)

    torch_params = {"w1_t": w1_t, "b1": b1, "g1": g1, "be1": be1, "m1": m1, "v1": v1,
                    "w2_t": w2_t, "b2": b2, "g2": g2, "be2": be2, "m2": m2, "v2": v2,
                    "wp_t": wp_t, "bp": bp}

    # Input in PyTorch NCL layout.
    x_ncl = jax.random.normal(jax.random.PRNGKey(42), (N, Cin, L), jnp.float32)

    out_ncl = residual_block_forward(x_ncl, torch_params)
    out_ncl = jax.block_until_ready(out_ncl)

    # Correctness check against a plain-JAX (lax.conv, f32) reference.
    # Tolerance loosened because matmul inputs are bf16 on the MXU.
    ref_ncl = _reference_ncl(x_ncl, torch_params)
    assert out_ncl.shape == (N, Cout, L)
    assert jnp.allclose(out_ncl, ref_ncl, rtol=5e-2, atol=5e-2), (
        float(jnp.max(jnp.abs(out_ncl - ref_ncl))))

    print("KERNEL_OK")
</pallas_src>

<mosaic_0001>
module attributes {stable_mosaic.version = 11 : i64} {
  func.func @kernel(%arg0: i32, %arg1: i32, %arg2: memref<1x1x20x128xbf16, #tpu.memory_space<vmem>>, %arg3: memref<3x128x128xbf16, #tpu.memory_space<vmem>>, %arg4: memref<3x128x128xbf16, #tpu.memory_space<vmem>>, %arg5: memref<128x128xbf16, #tpu.memory_space<vmem>>, %arg6: memref<1x128xf32, #tpu.memory_space<vmem>>, %arg7: memref<1x128xf32, #tpu.memory_space<vmem>>, %arg8: memref<1x128xf32, #tpu.memory_space<vmem>>, %arg9: memref<1x16x128xf32, #tpu.memory_space<vmem>>) attributes {dimension_semantics = [#tpu.dimension_semantics<parallel>, #tpu.dimension_semantics<parallel>], iteration_bounds = array<i64: 2, 1>, scalar_prefetch = 0 : i64, scratch_operands = 0 : i64, tpu.core_type = #tpu.core_type<tc>, window_params = [{transform_indices = @transform_0, window_bounds = array<i64: 1, 1, 20, 128>}, {pipeline_mode = #tpu.pipeline_mode<synchronous>, transform_indices = @transform_1, window_bounds = array<i64: 3, 128, 128>}, {pipeline_mode = #tpu.pipeline_mode<synchronous>, transform_indices = @transform_2, window_bounds = array<i64: 3, 128, 128>}, {pipeline_mode = #tpu.pipeline_mode<synchronous>, transform_indices = @transform_3, window_bounds = array<i64: 128, 128>}, {pipeline_mode = #tpu.pipeline_mode<synchronous>, transform_indices = @transform_4, window_bounds = array<i64: 1, 128>}, {pipeline_mode = #tpu.pipeline_mode<synchronous>, transform_indices = @transform_5, window_bounds = array<i64: 1, 128>}, {pipeline_mode = #tpu.pipeline_mode<synchronous>, transform_indices = @transform_6, window_bounds = array<i64: 1, 128>}, {transform_indices = @transform_7, window_bounds = array<i64: 1, 16, 128>}]} {
    %c0 = arith.constant 0 : index
    %c0_0 = arith.constant 0 : index
    %c0_1 = arith.constant 0 : index
    %c0_2 = arith.constant 0 : index
    %0 = vector.load %arg2[%c0, %c0_0, %c0_1, %c0_2] : memref<1x1x20x128xbf16, #tpu.memory_space<vmem>>, vector<1x1x18x128xbf16>
    %1 = vector.shape_cast %0 : vector<1x1x18x128xbf16> to vector<18x128xbf16>
    %c0_3 = arith.constant 0 : index
    %c0_4 = arith.constant 0 : index
    %c1 = arith.constant 1 : index
    %c0_5 = arith.constant 0 : index
    %2 = vector.load %arg2[%c0_3, %c0_4, %c1, %c0_5] : memref<1x1x20x128xbf16, #tpu.memory_space<vmem>>, vector<1x1x18x128xbf16>
    %3 = vector.shape_cast %2 : vector<1x1x18x128xbf16> to vector<18x128xbf16>
    %c0_6 = arith.constant 0 : index
    %c0_7 = arith.constant 0 : index
    %c2 = arith.constant 2 : index
    %c0_8 = arith.constant 0 : index
    %4 = vector.load %arg2[%c0_6, %c0_7, %c2, %c0_8] : memref<1x1x20x128xbf16, #tpu.memory_space<vmem>>, vector<1x1x18x128xbf16>
    %5 = vector.shape_cast %4 : vector<1x1x18x128xbf16> to vector<18x128xbf16>
    %c0_9 = arith.constant 0 : index
    %c0_10 = arith.constant 0 : index
    %c0_11 = arith.constant 0 : index
    %6 = vector.load %arg3[%c0_9, %c0_10, %c0_11] : memref<3x128x128xbf16, #tpu.memory_space<vmem>>, vector<1x128x128xbf16>
    %7 = vector.shape_cast %6 : vector<1x128x128xbf16> to vector<128x128xbf16>
    %cst = arith.constant dense<0.000000e+00> : vector<18x128xf32>
    %8 = tpu.matmul %1, %7, %cst {dimension_numbers = #tpu.dot_dimension_numbers<[1], [0], [0], [1], [0, 0, 1, 1], [], []>} : vector<18x128xbf16>, vector<128x128xbf16>, vector<18x128xf32> -> vector<18x128xf32>
    %c1_12 = arith.constant 1 : index
    %c0_13 = arith.constant 0 : index
    %c0_14 = arith.constant 0 : index
    %9 = vector.load %arg3[%c1_12, %c0_13, %c0_14] : memref<3x128x128xbf16, #tpu.memory_space<vmem>>, vector<1x128x128xbf16>
    %10 = vector.shape_cast %9 : vector<1x128x128xbf16> to vector<128x128xbf16>
    %cst_15 = arith.constant dense<0.000000e+00> : vector<18x128xf32>
    %11 = tpu.matmul %3, %10, %cst_15 {dimension_numbers = #tpu.dot_dimension_numbers<[1], [0], [0], [1], [0, 0, 1, 1], [], []>} : vector<18x128xbf16>, vector<128x128xbf16>, vector<18x128xf32> -> vector<18x128xf32>
    %12 = arith.addf %8, %11 : vector<18x128xf32>
    %c2_16 = arith.constant 2 : index
    %c0_17 = arith.constant 0 : index
    %c0_18 = arith.constant 0 : index
    %13 = vector.load %arg3[%c2_16, %c0_17, %c0_18] : memref<3x128x128xbf16, #tpu.memory_space<vmem>>, vector<1x128x128xbf16>
    %14 = vector.shape_cast %13 : vector<1x128x128xbf16> to vector<128x128xbf16>
    %cst_19 = arith.constant dense<0.000000e+00> : vector<18x128xf32>
    %15 = tpu.matmul %5, %14, %cst_19 {dimension_numbers = #tpu.dot_dimension_numbers<[1], [0], [0], [1], [0, 0, 1, 1], [], []>} : vector<18x128xbf16>, vector<128x128xbf16>, vector<18x128xf32> -> vector<18x128xf32>
    %16 = arith.addf %12, %15 : vector<18x128xf32>
    %c0_20 = arith.constant 0 : index
    %c0_21 = arith.constant 0 : index
    %17 = vector.load %arg6[%c0_20, %c0_21] : memref<1x128xf32, #tpu.memory_space<vmem>>, vector<1x128xf32>
    %18 = vector.broadcast %17 : vector<1x128xf32> to vector<18x128xf32>
    %19 = arith.addf %16, %18 : vector<18x128xf32>
    %cst_22 = arith.constant 0.000000e+00 : f32
    %20 = vector.broadcast %cst_22 : f32 to vector<18x128xf32>
    %21 = arith.cmpf ogt, %19, %20 : vector<18x128xf32>
    %cst_23 = arith.constant 0.00999999977 : f32
    %22 = vector.broadcast %cst_23 : f32 to vector<18x128xf32>
    %23 = arith.mulf %22, %19 : vector<18x128xf32>
    %24 = arith.select %21, %19, %23 : vector<18x128xi1>, vector<18x128xf32>
    %c16_i32 = arith.constant 16 : i32
    %25 = arith.muli %arg1, %c16_i32 : i32
    %c1_i32 = arith.constant 1 : i32
    %26 = arith.subi %25, %c1_i32 : i32
    %27 = tpu.iota {dimensions = array<i32: 0>} : vector<18x1xi32>
    %28 = vector.broadcast %26 : i32 to vector<18x1xi32>
    %29 = arith.addi %28, %27 : vector<18x1xi32>
    %c0_i32 = arith.constant 0 : i32
    %30 = vector.broadcast %c0_i32 : i32 to vector<18x1xi32>
    %31 = arith.cmpi sge, %29, %30 : vector<18x1xi32>
    %c16_i32_24 = arith.constant 16 : i32
    %32 = vector.broadcast %c16_i32_24 : i32 to vector<18x1xi32>
    %33 = arith.cmpi slt, %29, %32 : vector<18x1xi32>
    %34 = arith.andi %31, %33 : vector<18x1xi1>
    %cst_25 = arith.constant 0.000000e+00 : f32
    %35 = vector.shape_cast %34 : vector<18x1xi1> to vector<18x1xi1>
    %36 = vector.broadcast %35 : vector<18x1xi1> to vector<18x128xi1>
    %37 = vector.broadcast %cst_25 : f32 to vector<18x128xf32>
    %38 = arith.select %36, %24, %37 : vector<18x128xi1>, vector<18x128xf32>
    %39 = arith.truncf %38 : vector<18x128xf32> to vector<18x128xbf16>
    %40 = vector.extract_strided_slice %39 {offsets = [0, 0], sizes = [16, 128], strides = [1, 1]} : vector<18x128xbf16> to vector<16x128xbf16>
    %c0_26 = arith.constant 0 : index
    %c0_27 = arith.constant 0 : index
    %c0_28 = arith.constant 0 : index
    %41 = vector.load %arg4[%c0_26, %c0_27, %c0_28] : memref<3x128x128xbf16, #tpu.memory_space<vmem>>, vector<1x128x128xbf16>
    %42 = vector.shape_cast %41 : vector<1x128x128xbf16> to vector<128x128xbf16>
    %cst_29 = arith.constant dense<0.000000e+00> : vector<16x128xf32>
    %43 = tpu.matmul %40, %42, %cst_29 {dimension_numbers = #tpu.dot_dimension_numbers<[1], [0], [0], [1], [0, 0, 1, 1], [], []>} : vector<16x128xbf16>, vector<128x128xbf16>, vector<16x128xf32> -> vector<16x128xf32>
    %44 = vector.extract_strided_slice %39 {offsets = [1, 0], sizes = [16, 128], strides = [1, 1]} : vector<18x128xbf16> to vector<16x128xbf16>
    %c1_30 = arith.constant 1 : index
    %c0_31 = arith.constant 0 : index
    %c0_32 = arith.constant 0 : index
    %45 = vector.load %arg4[%c1_30, %c0_31, %c0_32] : memref<3x128x128xbf16, #tpu.memory_space<vmem>>, vector<1x128x128xbf16>
    %46 = vector.shape_cast %45 : vector<1x128x128xbf16> to vector<128x128xbf16>
    %cst_33 = arith.constant dense<0.000000e+00> : vector<16x128xf32>
    %47 = tpu.matmul %44, %46, %cst_33 {dimension_numbers = #tpu.dot_dimension_numbers<[1], [0], [0], [1], [0, 0, 1, 1], [], []>} : vector<16x128xbf16>, vector<128x128xbf16>, vector<16x128xf32> -> vector<16x128xf32>
    %48 = arith.addf %43, %47 : vector<16x128xf32>
    %49 = vector.extract_strided_slice %39 {offsets = [2, 0], sizes = [16, 128], strides = [1, 1]} : vector<18x128xbf16> to vector<16x128xbf16>
    %c2_34 = arith.constant 2 : index
    %c0_35 = arith.constant 0 : index
    %c0_36 = arith.constant 0 : index
    %50 = vector.load %arg4[%c2_34, %c0_35, %c0_36] : memref<3x128x128xbf16, #tpu.memory_space<vmem>>, vector<1x128x128xbf16>
    %51 = vector.shape_cast %50 : vector<1x128x128xbf16> to vector<128x128xbf16>
    %cst_37 = arith.constant dense<0.000000e+00> : vector<16x128xf32>
    %52 = tpu.matmul %49, %51, %cst_37 {dimension_numbers = #tpu.dot_dimension_numbers<[1], [0], [0], [1], [0, 0, 1, 1], [], []>} : vector<16x128xbf16>, vector<128x128xbf16>, vector<16x128xf32> -> vector<16x128xf32>
    %53 = arith.addf %48, %52 : vector<16x128xf32>
    %c0_38 = arith.constant 0 : index
    %c0_39 = arith.constant 0 : index
    %54 = vector.load %arg7[%c0_38, %c0_39] : memref<1x128xf32, #tpu.memory_space<vmem>>, vector<1x128xf32>
    %55 = vector.broadcast %54 : vector<1x128xf32> to vector<16x128xf32>
    %56 = arith.addf %53, %55 : vector<16x128xf32>
    %cst_40 = arith.constant 0.000000e+00 : f32
    %57 = vector.broadcast %cst_40 : f32 to vector<16x128xf32>
    %58 = arith.cmpf ogt, %56, %57 : vector<16x128xf32>
    %cst_41 = arith.constant 0.00999999977 : f32
    %59 = vector.broadcast %cst_41 : f32 to vector<16x128xf32>
    %60 = arith.mulf %59, %56 : vector<16x128xf32>
    %61 = arith.select %58, %56, %60 : vector<16x128xi1>, vector<16x128xf32>
    %c0_42 = arith.constant 0 : index
    %c0_43 = arith.constant 0 : index
    %c2_44 = arith.constant 2 : index
    %c0_45 = arith.constant 0 : index
    %62 = vector.load %arg2[%c0_42, %c0_43, %c2_44, %c0_45] : memref<1x1x20x128xbf16, #tpu.memory_space<vmem>>, vector<1x1x16x128xbf16>
    %63 = vector.shape_cast %62 : vector<1x1x16x128xbf16> to vector<16x128xbf16>
    %c0_46 = arith.constant 0 : index
    %c0_47 = arith.constant 0 : index
    %64 = vector.load %arg5[%c0_46, %c0_47] : memref<128x128xbf16, #tpu.memory_space<vmem>>, vector<128x128xbf16>
    %cst_48 = arith.constant dense<0.000000e+00> : vector<16x128xf32>
    %65 = tpu.matmul %63, %64, %cst_48 {dimension_numbers = #tpu.dot_dimension_numbers<[1], [0], [0], [1], [0, 0, 1, 1], [], []>} : vector<16x128xbf16>, vector<128x128xbf16>, vector<16x128xf32> -> vector<16x128xf32>
    %c0_49 = arith.constant 0 : index
    %c0_50 = arith.constant 0 : index
    %66 = vector.load %arg8[%c0_49, %c0_50] : memref<1x128xf32, #tpu.memory_space<vmem>>, vector<1x128xf32>
    %67 = vector.broadcast %66 : vector<1x128xf32> to vector<16x128xf32>
    %68 = arith.addf %65, %67 : vector<16x128xf32>
    %69 = arith.addf %61, %68 : vector<16x128xf32>
    %cst_51 = arith.constant 0.000000e+00 : f32
    %70 = vector.broadcast %cst_51 : f32 to vector<16x128xf32>
    %71 = arith.cmpf ogt, %69, %70 : vector<16x128xf32>
    %cst_52 = arith.constant 0.00999999977 : f32
    %72 = vector.broadcast %cst_52 : f32 to vector<16x128xf32>
    %73 = arith.mulf %72, %69 : vector<16x128xf32>
    %74 = arith.select %71, %69, %73 : vector<16x128xi1>, vector<16x128xf32>
    %c0_53 = arith.constant 0 : index
    %c0_54 = arith.constant 0 : index
    %c0_55 = arith.constant 0 : index
    %75 = vector.load %arg9[%c0_53, %c0_54, %c0_55] : memref<1x16x128xf32, #tpu.memory_space<vmem>>, vector<1x16x128xf32>
    %76 = vector.shape_cast %75 : vector<1x16x128xf32> to vector<16x128xf32>
    %77 = vector.shape_cast %74 : vector<16x128xf32> to vector<1x16x128xf32>
    tpu.vector_store %arg9[%c0_53, %c0_54, %c0_55], %77 {strides = array<i32>} : memref<1x16x128xf32, #tpu.memory_space<vmem>>, vector<1x16x128xf32>,
    return
  }
  func.func @transform_0(%arg0: i32, %arg1: i32) -> (i32, i32, i32, i32) {
    %c0_i32 = arith.constant 0 : i32
    %c0_i32_0 = arith.constant 0 : i32
    %c0_i32_1 = arith.constant 0 : i32
    return %arg0, %arg1, %c0_i32, %c0_i32_0 : i32, i32, i32, i32
  }
  func.func @transform_1(%arg0: i32, %arg1: i32) -> (i32, i32, i32) {
    %c0_i32 = arith.constant 0 : i32
    %c0_i32_0 = arith.constant 0 : i32
    %c0_i32_1 = arith.constant 0 : i32
    %c0_i32_2 = arith.constant 0 : i32
    return %c0_i32, %c0_i32_0, %c0_i32_1 : i32, i32, i32
  }
  func.func @transform_2(%arg0: i32, %arg1: i32) -> (i32, i32, i32) {
    %c0_i32 = arith.constant 0 : i32
    %c0_i32_0 = arith.constant 0 : i32
    %c0_i32_1 = arith.constant 0 : i32
    %c0_i32_2 = arith.constant 0 : i32
    return %c0_i32, %c0_i32_0, %c0_i32_1 : i32, i32, i32
  }
  func.func @transform_3(%arg0: i32, %arg1: i32) -> (i32, i32) {
    %c0_i32 = arith.constant 0 : i32
    %c0_i32_0 = arith.constant 0 : i32
    %c0_i32_1 = arith.constant 0 : i32
    return %c0_i32, %c0_i32_0 : i32, i32
  }
  func.func @transform_4(%arg0: i32, %arg1: i32) -> (i32, i32) {
    %c0_i32 = arith.constant 0 : i32
    %c0_i32_0 = arith.constant 0 : i32
    %c0_i32_1 = arith.constant 0 : i32
    return %c0_i32, %c0_i32_0 : i32, i32
  }
  func.func @transform_5(%arg0: i32, %arg1: i32) -> (i32, i32) {
    %c0_i32 = arith.constant 0 : i32
    %c0_i32_0 = arith.constant 0 : i32
    %c0_i32_1 = arith.constant 0 : i32
    return %c0_i32, %c0_i32_0 : i32, i32
  }
  func.func @transform_6(%arg0: i32, %arg1: i32) -> (i32, i32) {
    %c0_i32 = arith.constant 0 : i32
    %c0_i32_0 = arith.constant 0 : i32
    %c0_i32_1 = arith.constant 0 : i32
    return %c0_i32, %c0_i32_0 : i32, i32
  }
  func.func @transform_7(%arg0: i32, %arg1: i32) -> (i32, i32, i32) {
    %c0_i32 = arith.constant 0 : i32
    %c0_i32_0 = arith.constant 0 : i32
    return %arg0, %arg1, %c0_i32 : i32, i32, i32
  }
}

</mosaic_0001>

<bundles_post_ra>
// kernel: tpu_custom_call.1
= control target key start
LH: loop header
LB: loop body
LE: loop exit
PB: predicated region body
PF: predicated region fallthrough
CT: control target
= control target key end

     0   :  { %s2349_s0 = inlined_call_operand.vmem [shape: bf16[2,1,20,128], index: 0, kind: input, shape index: {}]   ;;  %s2350_s1 = inlined_call_operand.hbm [shape: bf16[3,128,128], index: 1, kind: input, shape index: {}]   ;;  %s2351_s2 = inlined_call_operand.hbm [shape: bf16[3,128,128], index: 2, kind: input, shape index: {}]   ;;  %s2352_s3 = inlined_call_operand.hbm [shape: bf16[128,128], index: 3, kind: input, shape index: {}]   ;;  %s2353_s4 = inlined_call_operand.vmem [shape: f32[1,128], index: 4, kind: input, shape index: {}]   ;;  %s2354_s5 = inlined_call_operand.vmem [shape: f32[1,128], index: 5, kind: input, shape index: {}]   ;;  %s2355_s6 = inlined_call_operand.vmem [shape: f32[1,128], index: 6, kind: input, shape index: {}]   ;;  %s2356_s7 = inlined_call_operand.hbm [shape: f32[2,16,128], index: 7, kind: output, shape index: {}]  }
   0x1   :  { %2364 = sst [smem:[#allocation16_spill]] %s2351_s2 }
   0x2   :  { %12 = vsyncpa [#allocation3], 0 }
   0x3   :  { %13 = vsyncpa [#allocation6], 0 }
   0x4   :  { %14 = vsyncpa [#allocation4], 0 }
   0x5   :  { %16 = vsyncpa [#allocation4 + $0x1], 0  ;;  %s2061_s24 = smov 0   ;;  %s2063_s25 = smov 0  }
   0x6   :  { %s2065_s26 = smov 0   ;;  %s2067_s27 = smov 0  }
   0x7   :  { %s2069_s28 = smov 0   ;;  %s2071_s29 = smov 0  }
   0x8 LB: > { %2365 = sst [smem:[#allocation12_spill]] %s1996_s26  ;;  %s1393_s30 = sadd.s32 4294967295, %s2008_s29   ;;  %s2008_s29 = sphi %s2071_s29, %s22_s29   ;;  %s2004_s28 = sphi %s2069_s28, %s2383_s28   ;;  %s2000_s27 = sphi %s2067_s27, %s2382_s27   ;;  %s1996_s26 = sphi %s2065_s26, %s2381_s26   ;;  %s1992_s25 = sphi %s2063_s25, %s2385_s25   ;;  %s1988_s24 = sphi %s2061_s24, %s2384_s24  }
   0x9   : > { %2366 = sst [smem:[#allocation13_spill]] %s2004_s28  ;;  %s1394_s8 = sadd.s32 4294967294, %s2008_s29  }
   0xa   : > { %s34_s9 = sadd.s32 1, %s2004_s28  ;;  %s197_s10 = sadd.s32 1, %s1996_s26 }
   0xb   : > { %p36_p0 = scmp.ge.s32.totalorder %s34_s9, 2  ;;  %p207_p1 = scmp.ne.s32.totalorder %s1996_s26, %s1992_s25 }
   0xc   : > { %p208_p2 = scmp.eq.s32.totalorder %s1393_s30, 1  ;;  %p213_p3 = scmp.ne.s32.totalorder %s1992_s25, %s1988_s24 }
   0xd   : > { %s2387_s9 = smov (%p36_p0, %s34_s9), 0  ;;  %p214_p5 = scmp.eq.s32.totalorder %s1394_s8, 1 }
   0xe   : > { %2367 = sst [smem:[#allocation14_spill]] %s2387_s9  ;;  %p2101_p4 = por %p208_p2, %p207_p1 }
   0xf   : > { %s192_s12 = ssub.s32 %s2004_s28, %s2387_s9  ;;  %p1395_p6 = scmp.ge.s32.totalorder %s2008_s29, 1 }
  0x10   : > { %s2368_s11 = scalar_select %p2101_p4, 1, 0 }
  0x11   : > { %p195_p7 = scmp.eq.s32.totalorder %s192_s12, 0  ;;  %p2108_p8 = por %p214_p5, %p213_p3 }
  0x12   : > { %p221_p9 = scmp.lt.s32.totalorder %s2008_s29, 3  ;;  %p2120_p11 = scmp.eq.s32.totalorder %s1393_s30, 0 }
  0x13   : > { %s2369_s13 = scalar_select %p2108_p8, 1, 0 }
  0x14   : > { %s2114_s14 = scalar_select %p195_p7, %s1996_s26, %s197_s10  }
  0x15   : > { %p2116_p10 = pnand %p1395_p6, %p221_p9  ;;  %s2010_s17 = smov [#allocation5]  }
  0x16   : > { %2370 = sst [smem:[#allocation15_spill]] %s2114_s14  ;;  %s246_s18 = sshll.u32 %s2010_s17, 4  ;;  %s247_s18 = int_to_ptr.vmem [resolvable:$true] %s246_s18 }
  0x17   : > { %s2371_s15 = scalar_select %p2116_p10, 1, 0 }
  0x18   : > { %s2372_s16 = scalar_select %p2120_p11, 1, 0 }
  0x19   : > { %p1699_p12 = pneg %p2116_p10  ;;  %s2011_s20 = smov [#allocation2]  }
  0x1a   : > { %s233_s21 = sshll.u32 %s2011_s20, 4  ;;  %s2374_s2 = sld [smem:[#allocation16_spill]]  ;;  %s234_s21 = int_to_ptr.vmem [resolvable:$true] %s233_s21 }
  0x1b   : > { %p2128_p13 = pnand %p2120_p11, %p1699_p12 }
  0x1d   : > { %p2140_p1 = pneg %p2128_p13 }
  0x20   : > { %s1838_s30 = scalar_lea.hbm %s2374_s2, 3072 }
  0x21   : > { %p1839_p0 = scmp.ne.s32.totalorder %s2374_s2, %s1838_s30  ;;  %p1845_p5 = scmp.lt.u32.totalorder %s1838_s30, %s2374_s2 }
  0x23   : > { %p1841_p2 = pnand %p2140_p1, %p1839_p0 }
  0x25   : > { %p1842_p3 = pneg %p1841_p2 }
  0x27   : > { %p1847_p6 = pnand %p1845_p5, %p1842_p3 }
  0x29   : > { %1850 = shalt.err (!%p1847_p6)
}
  0x2a   : > { %s1851_s20 = scalar_lea.vmem %s247_s18, 3072  ;;  %p1859_p8 = scmp.lt.s32.totalorder %s247_s18, %s247_s18 }
  0x2b   : > { %p1852_p7 = scmp.ne.s32.totalorder %s247_s18, %s1851_s20  ;;  %p1860_p4 = scmp.lt.s32.totalorder %s1851_s20, %s1851_s20 }
  0x2d   : > { %p1854_p9 = pnand %p1852_p7, %p2140_p1  ;;  %p1861_p11 = por %p1860_p4, %p1859_p8 }
  0x2f   : > { %p1855_p12 = pneg %p1854_p9 }
  0x31   : > { %p1862_p10 = pnand %p1861_p11, %p1855_p12 }
  0x33   : > { %1865 = shalt.err (!%p1862_p10)
}
  0x34   : > { %s2012_s22 = smov 64   ;;  %s2013_s23 = smov 4  }
  0x35   : > { %1705 = dma.hbm_to_vmem [thread:$0]  (!%p2128_p13), %s2374_s2, 3072, %s247_s18, [#allocation6], %s2012_s22, %s2012_s22, %s2013_s23  }
  0x36   : > { %s1866_s17 = scalar_lea.hbm %s2350_s1, 3072 }
  0x37   : > { %p1867_p4 = scmp.ne.s32.totalorder %s2350_s1, %s1866_s17  ;;  %p1873_p11 = scmp.lt.u32.totalorder %s1866_s17, %s2350_s1 }
  0x39   : > { %p1869_p8 = pnand %p1867_p4, %p2140_p1 }
  0x3b   : > { %p1870_p10 = pneg %p1869_p8 }
  0x3d   : > { %p1875_p0 = pnand %p1873_p11, %p1870_p10 }
  0x3f   : > { %1878 = shalt.err (!%p1875_p0)
}
  0x40   : > { %s1879_s9 = scalar_lea.vmem %s234_s21, 3072  ;;  %p1887_p6 = scmp.lt.s32.totalorder %s234_s21, %s234_s21 }
  0x41   : > { %p1880_p2 = scmp.ne.s32.totalorder %s234_s21, %s1879_s9  ;;  %p1888_p7 = scmp.lt.s32.totalorder %s1879_s9, %s1879_s9 }
  0x43   : > { %p1882_p3 = pnand %p1880_p2, %p2140_p1  ;;  %p1889_p9 = por %p1888_p7, %p1887_p6 }
  0x45   : > { %p1883_p5 = pneg %p1882_p3 }
  0x47   : > { %p1890_p12 = pnand %p1889_p9, %p1883_p5 }
  0x49   : > { %1893 = shalt.err (!%p1890_p12)
}
  0x4a   : > { %1702 = dma.hbm_to_vmem [thread:$0]  (!%p2128_p13), %s2350_s1, 3072, %s234_s21, [#allocation3], %s2012_s22, %s2012_s22, %s2013_s23  }
  0x4b   : > { %s2014_s14 = smov [#allocation7]   ;;  %s1894_s10 = scalar_lea.hbm %s2352_s3, 1024 }
  0x4c   : > { %s259_s18 = sshll.u32 %s2014_s14, 4  ;;  %p1895_p4 = scmp.ne.s32.totalorder %s2352_s3, %s1894_s10  ;;  %s260_s18 = int_to_ptr.vmem [resolvable:$true] %s259_s18 }
  0x4d   : > { %p1901_p11 = scmp.lt.u32.totalorder %s1894_s10, %s2352_s3 }
  0x4e   : > { %p1897_p8 = pnand %p1895_p4, %p2140_p1 }
  0x50   : > { %p1898_p10 = pneg %p1897_p8 }
  0x52   : > { %p1903_p0 = pnand %p1901_p11, %p1898_p10 }
  0x54   : > { %1906 = shalt.err (!%p1903_p0)
}
  0x55   : > { %s1907_s21 = scalar_lea.vmem %s260_s18, 1024  ;;  %p1915_p6 = scmp.lt.s32.totalorder %s260_s18, %s260_s18 }
  0x56   : > { %p1908_p2 = scmp.ne.s32.totalorder %s260_s18, %s1907_s21  ;;  %p1916_p7 = scmp.lt.s32.totalorder %s1907_s21, %s1907_s21 }
  0x58   : > { %p1910_p3 = pnand %p1908_p2, %p2140_p1  ;;  %p1917_p9 = por %p1916_p7, %p1915_p6 }
  0x5a   : > { %p1911_p5 = pneg %p1910_p3 }
  0x5c   : > { %p1918_p12 = pnand %p1917_p9, %p1911_p5 }
  0x5e   : > { %1921 = shalt.err (!%p1918_p12)
}
  0x5f   : > { %1708 = dma.hbm_to_vmem [thread:$0]  (!%p2128_p13), %s2352_s3, 1024, %s260_s18, [#allocation6], %s2012_s22, %s2012_s22, %s2013_s23  }
  0x60   : > { %p2376_p4 = scmp.ne.s32.totalorder %s2371_s15, 0 }
  0x61   : > { %p2377_p1 = scmp.ne.s32.totalorder (!%p2376_p4), %s2372_s16, 0 }
  0x62   : > { %296 = sbr.rel (%p2376_p4) target bundleno = 677 (0x2a5), region = 48 }
  0x69   : > { %1975 = dma.done.wait (%p2377_p1), [#allocation3], 3072  }
  0x6a   : > { %1977 = vsyncadd (%p2377_p1), [#allocation3], 4294964224 }
  0x6b   : > { %1979 = dma.done.wait (%p2377_p1), [#allocation6], 4096  }
  0x6c   : > { %1981 = vsyncadd (%p2377_p1), [#allocation6], 4294963200  ;;  %v1778_v0 = vld [vmem:[#allocation2 + $0x40] sm:$0xff]   ;;  %p340_p13 = scmp.lt.s32.totalorder %s2000_s27, 1  ;;  %v1780_v2 = vld [vmem:[#allocation2 + $0x48] sm:$0xff]   ;;  %vm632_vm1 = vcmask 1046528  }
  0x6d   : > { %v1779_v1 = vld [vmem:[#allocation2] sm:$0xff]   ;;  %1544 = vmatprep.subr.bf16.mxu0 %v1778_v0  ;;  %v1781_v3 = vld [vmem:[#allocation2 + $0x8] sm:$0xff]   ;;  %v1782_v4 = vld [vmem:[#allocation2 + $0x50] sm:$0xff]   ;;  %vm397_vm0 = vsmask.f32 7424  ;;  %v2015_v45 = vmov 0.0  }
  0x6e   : > { %1564 = vmatprep.subr.bf16.mxu1 %v1779_v1  ;;  %1545 = vmatpush3.bf16.msra.mxu0 %v1778_v0  ;;  %v1783_v5 = vld [vmem:[#allocation2 + $0x10] sm:$0xff]   ;;  %s341_s15 = scalar_select %p340_p13, %s2000_s27, 1  ;;  %v1784_v6 = vld [vmem:[#allocation2 + $0x58] sm:$0xff]   ;;  %v1786_v8 = vld [vmem:[#allocation2 + $0x60] sm:$0xff]   ;;  %vm2016_vm2 = vmmov 0   ;;  %vm2017_vm8 = vmmov 1  }
  0x6f   : > { %1565 = vmatpush3.bf16.msra.mxu1 %v1779_v1  ;;  %1546 = vmatprep.subr.bf16.mxu0 %v1780_v2  ;;  %v1785_v7 = vld [vmem:[#allocation2 + $0x18] sm:$0xff]   ;;  %v1787_v9 = vld [vmem:[#allocation2 + $0x20] sm:$0xff]   ;;  %v1788_v10 = vld [vmem:[#allocation2 + $0x68] sm:$0xff]   ;;  %s337_s30 = sand.u32 1, %s1992_s25   ;;  %s1477_s21 = sshll.u32 %s2000_s27, 8 }
  0x70   : > { %1566 = vmatprep.subr.bf16.mxu1 %v1781_v3  ;;  %s1684_s16 = smul.u32 12, %s341_s15  ;;  %v1789_v13 = vld [vmem:[#allocation2 + $0x28] sm:$0xff]   ;;  %v1790_v16 = vld [vmem:[#allocation2 + $0x70] sm:$0xff]   ;;  %v1792_v24 = vld [vmem:[#allocation2 + $0x78] sm:$0xff]   ;;  %s1404_s17 = sshll.u32 %s337_s30, 4 }
  0x71   : > { %v1791_v20 = vld [vmem:[#allocation2 + $0x30] sm:$0xff]   ;;  %v1793_v25 = vld [vmem:[#allocation2 + $0x38] sm:$0xff]   ;;  %v1797_v28 = vld [vmem:[#allocation2 + $0x80] sm:$0xff]   ;;  %s339_s20 = scalar_lea.vmem [#allocation8], %s1404_s17  ;;  %s2299_s15 = scalar_lea.hbm %s2356_s7, %s1477_s21 }
  0x72   : > { %1547 = vmatpush3.bf16.msra.mxu0 %v1780_v2  ;;  %s2216_s22 = scalar_lea.vmem %s2349_s0, %s1684_s16  ;;  %v1798_v34 = vld [vmem:[#allocation2 + $0x88] sm:$0xff]   ;;  %v1799_v37 = vld [vmem:[#allocation2 + $0x90] sm:$0xff]   ;;  %v1800_v38 = vld [vmem:[#allocation2 + $0x98] sm:$0xff]   ;;  %s1280_s9 = sshll.u32 %s339_s20, 4  ;;  %s2294_s9 = int_to_ptr.vmem [resolvable:$true] %s1280_s9 }
  0x73   : > { %1567 = vmatpush3.bf16.msra.mxu1 %v1781_v3  ;;  %1548 = vmatprep.subr.bf16.mxu0 %v1782_v4  ;;  %v351_v11 = vld [vmem:[%s2216_s22] sm:$0xf]  ;;  %v352_v12 = vld [vmem:[%s2216_s22 + $0x4] sm:$0xf]  ;;  %v1802_v40 = vld [vmem:[#allocation2 + $0xa8] sm:$0xff]   ;;  %s2303_s27 = scalar_lea.sflag [#allocation4], %s337_s30 }
  0x74   : > { %1568 = vmatprep.subr.bf16.mxu1 %v1783_v5  ;;  %v1406_v14 = vcombine.low %v351_v11, %v352_v12  ;;  %v2221_v15 = vld [vmem:[%s2216_s22 + $0x8] ss:$0 sps:$4 sm:$0x33]   ;;  %v355_v30 = vld [vmem:[%s2216_s22] sm:$0xe]  ;;  %v1803_v41 = vld [vmem:[#allocation2 + $0xb0] sm:$0xff]  }
  0x75   : > { %v406_v19 = vshll.u32 %v2221_v15, 16  ;;  %v410_v27 = vshrl.u32 %v2221_v15, 16  ;;  %v634_v29 = vrot.slane %v2221_v15, 1  ;;  %v1425_v31 = vcombine.low %v355_v30, %v352_v12  ;;  %v2229_v32 = vld [vmem:[%s2216_s22 + $0x8] ss:$0 sps:$4 sm:$0x11]  }
  0x76   : > { %1549 = vmatpush3.bf16.msra.mxu0 %v1782_v4  ;;  %v399_v17 = vshrl.u32 %v1406_v14, 16  ;;  %v401_v18 = vshll.u32 %v1406_v14, 16  ;;  %1580 = vmatprep.mubr.bf16.mxu1 %v1406_v14  ;;  %v1801_v39 = vld [vmem:[#allocation2 + $0xa0] sm:$0xff]   ;;  %v1804_v42 = vld [vmem:[#allocation2 + $0xb8] sm:$0xff]   ;;  %v1807_v46 = vld [vmem:[#allocation5 + $0x8] sm:$0xff]   ;;  %s1922_s16 = scalar_lea.vmem %s2294_s9, 256 }
  0x77   : > { %1569 = vmatpush3.bf16.msra.mxu1 %v1783_v5  ;;  %1550 = vmatprep.subr.bf16.mxu0 %v1784_v6  ;;  %v408_v22 = vrot.slane %v406_v19, 1  ;;  %v2231_v35 = vrot.slane %v1425_v31, 1  ;;  %v1806_v43 = vld [vmem:[#allocation5] sm:$0xff]   ;;  %v1810_v47 = vld [vmem:[#allocation5 + $0x48] sm:$0xff]   ;;  %v1809_v48 = vld [vmem:[#allocation5 + $0x10] sm:$0xff]   ;;  %p1923_p8 = scmp.ne.s32.totalorder %s2294_s9, %s1922_s16  ;;  %p2378_p10 = scmp.ne.s32.totalorder %s2368_s11, 0 }
  0x78   : > { %1570 = vmatprep.subr.bf16.mxu1 %v1785_v7  ;;  %v403_v21 = vrot.slane %v401_v18, 1  ;;  %v1808_v44 = vld [vmem:[#allocation5 + $0x40] sm:$0xff]   ;;  %v1812_v49 = vld [vmem:[#allocation5 + $0x50] sm:$0xff]   ;;  %v1811_v50 = vld [vmem:[#allocation5 + $0x18] sm:$0xff]   ;;  %s2018_s19 = smov [#allocation8]  }
  0x79   : > { %v412_v33 = vor.u32 %v410_v27, %v408_v22  ;;  %v635_v36 = vsel %vm632_vm1, %v2231_v35, %v634_v29  ;;  %v1813_v51 = vld [vmem:[#allocation5 + $0x20] sm:$0xff]   ;;  %v1814_v52 = vld [vmem:[#allocation5 + $0x58] sm:$0xff]   ;;  %v1815_v53 = vld [vmem:[#allocation5 + $0x28] sm:$0xff]   ;;  %p1924_p11 = pnand %p1923_p8, %p2378_p10  ;;  %s1926_s12 = sshll.u32 %s2018_s19, 4  ;;  %s1927_s12 = int_to_ptr.vmem [resolvable:$false] %s1926_s12 }
  0x7a   : > { %1551 = vmatpush3.bf16.msra.mxu0 %v1784_v6  ;;  %v404_v23 = vor.u32 %v403_v21, %v399_v17  ;;  %v1816_v54 = vld [vmem:[#allocation5 + $0x60] sm:$0xff]   ;;  %v1817_v55 = vld [vmem:[#allocation5 + $0x30] sm:$0xff]   ;;  %v1818_v56 = vld [vmem:[#allocation5 + $0x68] sm:$0xff]   ;;  %s1928_s22 = scalar_lea.vmem %s1927_s12, 512  ;;  %p1929_p2 = scmp.lt.s32.totalorder %s2294_s9, %s1927_s12 }
  0x7b   : > { %1571 = vmatpush3.bf16.msra.mxu1 %v1785_v7  ;;  %1552 = vmatprep.subr.bf16.mxu0 %v1786_v8  ;;  %v1819_v57 = vld [vmem:[#allocation5 + $0x38] sm:$0xff]   ;;  %v1820_v58 = vld [vmem:[#allocation5 + $0x70] sm:$0xff]   ;;  %v758_v7 = vlaneseq  ;;  %v1434_v11 = vld [vmem:[%s2353_s4] ss:$0 sm:$0xff]  ;;  %p1925_p0 = pneg %p1924_p11  ;;  %p1930_p3 = scmp.lt.s32.totalorder %s1928_s22, %s1922_s16 }
  0x7c   : > { %1572 = vmatprep.subr.bf16.mxu1 %v1787_v9  ;;  %v409_v26 = vsel %vm397_vm0, %v404_v23, %v408_v22  ;;  %v1821_v59 = vld [vmem:[#allocation5 + $0x78] sm:$0xff]  }
  0x7d   : > { %1560 = vmatprep.mubr.bf16.mxu0 %v409_v26  ;;  %p1931_p5 = por %p1930_p3, %p1929_p2 }
  0x7e   : > { %1553 = vmatpush3.bf16.msra.mxu0 %v1786_v8  ;;  %v759_v8 = vshrl.u32 %v758_v7, 7 }
  0x7f   : > { %1573 = vmatpush3.bf16.msra.mxu1 %v1787_v9  ;;  %1554 = vmatprep.subr.bf16.mxu0 %v1788_v10  ;;  %p1932_p6 = pnand %p1931_p5, %p1925_p0 }
  0x80   : > { %1574 = vmatprep.subr.bf16.mxu1 %v1789_v13  ;;  %v761_v9 = vadd.s32 16, %v759_v8  ;;  %v763_v17 = vadd.s32 4294967295, %v759_v8 }
  0x82   : > { %1555 = vmatpush3.bf16.msra.mxu0 %v1788_v10  ;;  %vm766_vm6 = vcmp.ge.s32.totalorder %v763_v17, 0 }
  0x83   : > { %1575 = vmatpush3.bf16.msra.mxu1 %v1789_v13  ;;  %1556 = vmatprep.subr.bf16.mxu0 %v1790_v16  ;;  %v765_v13 = vadd.s32 4294967295, %v761_v9  ;;  %vm1451_vm9 = vmpackc.low %vm2017_vm8, %vm766_vm6 }
  0x84   : > { %1576 = vmatprep.subr.bf16.mxu1 %v1791_v20 }
  0x85   : > { %vm771_vm4 = vcmp.lt.s32.totalorder %v765_v13, 16 }
  0x86   : > { %1557 = vmatpush3.bf16.msra.mxu0 %v1790_v16 }
  0x87   : > { %1577 = vmatpush3.bf16.msra.mxu1 %v1791_v20  ;;  %1558 = vmatprep.subr.bf16.mxu0 %v1792_v24 }
  0x88   : > { %1578 = vmatprep.subr.bf16.mxu1 %v1793_v25 }
  0x8a   : > { %1559 = vmatpush3.bf16.msra.mxu0 %v1792_v24 }
  0x8b   : > { %1579 = vmatpush3.bf16.msra.mxu1 %v1793_v25  ;;  %1584 = vmatprep.subr.bf16.mxu0 %v1797_v28 }
  0x8c   : > { %1604 = vmatprep.subr.bf16.mxu1 %v2015_v45 }
  0x8d   : > { %1561 = vmatmul.mubr.bf16.vlgmr.msra.gmra.mrb[0].mxu0 %v412_v33  ;;  %v1823_v33 = vld [vmem:[#allocation7] sm:$0xff]  }
  0x8e   : > { %1581 = vmatmul.mubr.bf16.vlgmr.msra.gmra.mrb[0].mxu1 %v2229_v32  ;;  %1585 = vmatpush3.bf16.msra.mxu0 %v1797_v28 }
  0x8f   : > { %1586 = vmatprep.subr.bf16.mxu0 %v1798_v34  ;;  %1600 = vmatprep.mubr.bf16.mxu0 %v635_v36 }
  0x90   : > { %1605 = vmatpush3.bf16.msra.mxu1 %v1808_v44  ;;  %1620 = vmatprep.mubr.msk.bf16.mxu1 %vm2016_vm2, %v2015_v45 }
  0x91   : > { %1606 = vmatprep.subr.bf16.mxu1 %v2015_v45 }
  0x92   : > { %1587 = vmatpush3.bf16.msra.mxu0 %v1798_v34 }
  0x93   : > { %1588 = vmatprep.subr.bf16.mxu0 %v1799_v37 }
  0x94   : > { %1607 = vmatpush3.bf16.msra.mxu1 %v1810_v47 }
  0x95   : > { %1608 = vmatprep.subr.bf16.mxu1 %v2015_v45 }
  0x96   : > { %1589 = vmatpush3.bf16.msra.mxu0 %v1799_v37 }
  0x97   : > { %1590 = vmatprep.subr.bf16.mxu0 %v1800_v38 }
  0x98   : > { %1609 = vmatpush3.bf16.msra.mxu1 %v1812_v49  ;;  %v1827_v49 = vld [vmem:[#allocation7 + $0x10] sm:$0xff]  }
  0x99   : > { %1610 = vmatprep.subr.bf16.mxu1 %v2015_v45 }
  0x9a   : > { %1591 = vmatpush3.bf16.msra.mxu0 %v1800_v38 }
  0x9b   : > { %1592 = vmatprep.subr.bf16.mxu0 %v1801_v39 }
  0x9c   : > { %1611 = vmatpush3.bf16.msra.mxu1 %v1814_v52  ;;  %v1829_v52 = vld [vmem:[#allocation7 + $0x18] sm:$0xff]  }
  0x9d   : > { %1612 = vmatprep.subr.bf16.mxu1 %v2015_v45 }
  0x9e   : > { %1593 = vmatpush3.bf16.msra.mxu0 %v1801_v39 }
  0x9f   : > { %1594 = vmatprep.subr.bf16.mxu0 %v1802_v40 }
  0xa0   : > { %1613 = vmatpush3.bf16.msra.mxu1 %v1816_v54  ;;  %v1831_v54 = vld [vmem:[#allocation7 + $0x20] sm:$0xff]  }
  0xa1   : > { %1614 = vmatprep.subr.bf16.mxu1 %v2015_v45 }
  0xa2   : > { %1595 = vmatpush3.bf16.msra.mxu0 %v1802_v40 }
  0xa3   : > { %1596 = vmatprep.subr.bf16.mxu0 %v1803_v41 }
  0xa4   : > { %1615 = vmatpush3.bf16.msra.mxu1 %v1818_v56  ;;  %v1833_v56 = vld [vmem:[#allocation7 + $0x28] sm:$0xff]  }
  0xa5   : > { %1616 = vmatprep.subr.bf16.mxu1 %v2015_v45 }
  0xa6   : > { %1597 = vmatpush3.bf16.msra.mxu0 %v1803_v41  ;;  %v1825_v41 = vld [vmem:[#allocation7 + $0x8] sm:$0xff]  }
  0xa7   : > { %1598 = vmatprep.subr.bf16.mxu0 %v1804_v42 }
  0xa8   : > { %1617 = vmatpush3.bf16.msra.mxu1 %v1820_v58  ;;  %v1835_v58 = vld [vmem:[#allocation7 + $0x30] sm:$0xff]  }
  0xa9   : > { %1618 = vmatprep.subr.bf16.mxu1 %v2015_v45 }
  0xaa   : > { %1599 = vmatpush3.bf16.msra.mxu0 %v1804_v42 }
  0xab   : > { %1624 = vmatprep.subr.bf16.mxu0 %v2015_v45 }
  0xac   : > { %1619 = vmatpush3.bf16.msra.mxu1 %v1821_v59  ;;  %v1832_v59 = vld [vmem:[#allocation5 + $0xa8] sm:$0xff]  }
  0xad   : > { %1601 = vmatmul.mubr.bf16.vlgmr.msra.gmra.mrb[4].mxu0 %v634_v29  ;;  %1644 = vmatprep.subr.bf16.mxu1 %v2015_v45 }
  0xae   : > { %1625 = vmatpush3.bf16.msra.mxu0 %v1806_v43  ;;  %1640 = vmatprep.mubr.msk.bf16.mxu0 %vm2016_vm2, %v2015_v45 }
  0xaf   : > { %1626 = vmatprep.subr.bf16.mxu0 %v2015_v45 }
  0xb2   : > { %1627 = vmatpush3.bf16.msra.mxu0 %v1807_v46 }
  0xb3   : > { %1628 = vmatprep.subr.bf16.mxu0 %v2015_v45 }
  0xb6   : > { %1629 = vmatpush3.bf16.msra.mxu0 %v1809_v48  ;;  %v1822_v48 = vld [vmem:[#allocation5 + $0x80] sm:$0xff]  }
  0xb7   : > { %1630 = vmatprep.subr.bf16.mxu0 %v2015_v45 }
  0xba   : > { %1631 = vmatpush3.bf16.msra.mxu0 %v1811_v50 }
  0xbb   : > { %1632 = vmatprep.subr.bf16.mxu0 %v2015_v45 }
  0xbe   : > { %1633 = vmatpush3.bf16.msra.mxu0 %v1813_v51  ;;  %v1824_v51 = vld [vmem:[#allocation5 + $0x88] sm:$0xff]  }
  0xbf   : > { %1634 = vmatprep.subr.bf16.mxu0 %v2015_v45 }
  0xc2   : > { %1635 = vmatpush3.bf16.msra.mxu0 %v1815_v53  ;;  %v1826_v53 = vld [vmem:[#allocation5 + $0x90] sm:$0xff]  }
  0xc3   : > { %1636 = vmatprep.subr.bf16.mxu0 %v2015_v45 }
  0xc6   : > { %1637 = vmatpush3.bf16.msra.mxu0 %v1817_v55  ;;  %v1828_v55 = vld [vmem:[#allocation5 + $0x98] sm:$0xff]  }
  0xc7   : > { %1638 = vmatprep.subr.bf16.mxu0 %v2015_v45 }
  0xca   : > { %1639 = vmatpush3.bf16.msra.mxu0 %v1819_v57  ;;  %v1830_v57 = vld [vmem:[#allocation5 + $0xa0] sm:$0xff]  }
  0xcb   : > { %1664 = vmatprep.subr.bf16.mxu0 %v2015_v45 }
 0x160   : > { %v1562_v60 = vpop.f32.mrb[0].mxu0 }
 0x161   : > { %v1582_v61 = vpop.f32.mrb[0].mxu1  ;;  %v497_v62 = vpop.f32.mrb[1].mxu0 }
 0x162   : > { %v607_v63 = vadd.f32 %v1582_v61, %v1562_v60  ;;  %v598_v0 = vpop.f32.mrb[1].mxu1  ;;  %v1563_v1 = vpop.f32.mrb[2].mxu0  ;;  %v1162_v60 = vrot.slane %v2229_v32, 1  ;;  %v1837_v61 = vld [vmem:[#allocation7 + $0x38] sm:$0xff]  }
 0x163   : > { %v599_v2 = vadd.f32 %v598_v0, %v497_v62  ;;  %v1583_v3 = vpop.f32.mrb[2].mxu1  ;;  %v500_v4 = vpop.f32.mrb[3].mxu0  ;;  %v1834_v62 = vld [vmem:[#allocation5 + $0xb0] sm:$0xff]   ;;  %v1836_v0 = vld [vmem:[#allocation5 + $0xb8] sm:$0xff]  }
 0x164   : > { %v601_v5 = vpop.f32.mrb[3].mxu1 }
 0x165   : > { %v602_v6 = vadd.f32 %v601_v5, %v500_v4 }
 0x180   : > { %v1602_v10 = vpop.f32.mrb[4].mxu0 }
 0x181   : > { %v736_v12 = vadd.f32 %v1602_v10, %v607_v63  ;;  %v720_v14 = vpop.f32.mrb[5].mxu0  ;;  %v1163_v63 = vsel %vm632_vm1, %v2231_v35, %v1162_v60 }
 0x182   : > { %v734_v15 = vadd.f32 %v720_v14, %v599_v2  ;;  %v1603_v16 = vpop.f32.mrb[6].mxu0 }
 0x183   : > { %v746_v18 = vadd.f32 %v1434_v11, %v736_v12  ;;  %v723_v19 = vpop.f32.mrb[7].mxu0  ;;  %v1463_v16 = vld [vmem:[%s2355_s6] ss:$0 sm:$0xff] }
 0x184   : > { %v744_v20 = vadd.f32 %v1434_v11, %v734_v15  ;;  %v735_v21 = vadd.f32 %v723_v19, %v602_v6 }
 0x185   : > { %vm749_vm3 = vcmp.gt.f32.partialorder %v746_v18, 0.0  ;;  %v752_v22 = vmul.f32 0.01, %v746_v18 }
 0x186   : > { %vm747_vm5 = vcmp.gt.f32.partialorder %v744_v20, 0.0  ;;  %v750_v23 = vmul.f32 0.01, %v744_v20  ;;  %v745_v24 = vadd.f32 %v1434_v11, %v735_v21 }
 0x187   : > { %v755_v25 = vsel %vm749_vm3, %v746_v18, %v752_v22 }
 0x188   : > { %v783_v26 = vsel %vm771_vm4, %v755_v25, 0.0  ;;  %v753_v27 = vsel %vm747_vm5, %v744_v20, %v750_v23  ;;  %vm748_vm7 = vcmp.gt.f32.partialorder %v745_v24, 0.0  ;;  %v751_v28 = vmul.f32 0.01, %v745_v24 }
 0x189   : > { %v785_v29 = vpack.c.bf16 %v783_v26, %v783_v26  ;;  %v781_v30 = vsel %vm766_vm6, %v753_v27, 0.0 }
 0x18a   : > { %v754_v31 = vsel %vm748_vm7, %v745_v24, %v751_v28 }
 0x18b   : > { %v1452_v34 = vpack.c.bf16 %v754_v31, %v753_v27  ;;  %v784_v36 = vpack.c.bf16 %v754_v31, %v781_v30  ;;  %v827_v38 = vshll.u32 %v785_v29, 16  ;;  %v1030_v40 = vrot.slane %v785_v29, 1 }
 0x18d   : > { %1641 = vmatmul.mubr.msk.bf16.vlgmr.msra.gmra.mrb[8].mxu0 %vm1451_vm9, %v1452_v34  ;;  %v822_v37 = vshll.u32 %v784_v36, 16  ;;  %v1029_v39 = vrot.slane %v784_v36, 1  ;;  %v820_v42 = vshrl.u32 %v784_v36, 16  ;;  %v829_v47 = vrot.slane %v827_v38, 1 }
 0x18e   : > { %1665 = vmatpush3.bf16.msra.mxu0 %v1823_v33  ;;  %1680 = vmatprep.mubr.msk.bf16.mxu0 %vm2016_vm2, %v2015_v45 }
 0x18f   : > { %v824_v43 = vrot.slane %v822_v37, 1  ;;  %1666 = vmatprep.subr.bf16.mxu0 %v2015_v45  ;;  %v1031_v44 = vsel %vm632_vm1, %v1029_v39, %v1030_v40 }
 0x191   : > { %v825_v46 = vor.u32 %v824_v43, %v820_v42 }
 0x192   : > { %1667 = vmatpush3.bf16.msra.mxu0 %v1825_v41 }
 0x193   : > { %v830_v50 = vsel %vm397_vm0, %v825_v46, %v829_v47  ;;  %1668 = vmatprep.subr.bf16.mxu0 %v2015_v45 }
 0x194   : > { %1621 = vmatmul.mubr.bf16.vlgmr.msra.gmra.mrb[4].mxu1 %v830_v50 }
 0x195   : > { %1645 = vmatpush3.bf16.msra.mxu1 %v1822_v48  ;;  %1660 = vmatprep.mubr.msk.bf16.mxu1 %vm2016_vm2, %v2015_v45 }
 0x196   : > { %1646 = vmatprep.subr.bf16.mxu1 %v2015_v45  ;;  %1669 = vmatpush3.bf16.msra.mxu0 %v1827_v49 }
 0x197   : > { %1670 = vmatprep.subr.bf16.mxu0 %v2015_v45 }
 0x199   : > { %1647 = vmatpush3.bf16.msra.mxu1 %v1824_v51 }
 0x19a   : > { %1648 = vmatprep.subr.bf16.mxu1 %v2015_v45  ;;  %1671 = vmatpush3.bf16.msra.mxu0 %v1829_v52 }
 0x19b   : > { %1672 = vmatprep.subr.bf16.mxu0 %v2015_v45 }
 0x19d   : > { %1649 = vmatpush3.bf16.msra.mxu1 %v1826_v53 }
 0x19e   : > { %1650 = vmatprep.subr.bf16.mxu1 %v2015_v45  ;;  %1673 = vmatpush3.bf16.msra.mxu0 %v1831_v54 }
 0x19f   : > { %1674 = vmatprep.subr.bf16.mxu0 %v2015_v45 }
 0x1a1   : > { %1651 = vmatpush3.bf16.msra.mxu1 %v1828_v55 }
 0x1a2   : > { %1652 = vmatprep.subr.bf16.mxu1 %v2015_v45  ;;  %1675 = vmatpush3.bf16.msra.mxu0 %v1833_v56 }
 0x1a3   : > { %1676 = vmatprep.subr.bf16.mxu0 %v2015_v45 }
 0x1a5   : > { %1653 = vmatpush3.bf16.msra.mxu1 %v1830_v57 }
 0x1a6   : > { %1654 = vmatprep.subr.bf16.mxu1 %v2015_v45  ;;  %1677 = vmatpush3.bf16.msra.mxu0 %v1835_v58 }
 0x1a7   : > { %1678 = vmatprep.subr.bf16.mxu0 %v2015_v45 }
 0x1a9   : > { %1655 = vmatpush3.bf16.msra.mxu1 %v1832_v59 }
 0x1aa   : > { %1656 = vmatprep.subr.bf16.mxu1 %v2015_v45  ;;  %1679 = vmatpush3.bf16.msra.mxu0 %v1837_v61 }
 0x1ad   : > { %1657 = vmatpush3.bf16.msra.mxu1 %v1834_v62  ;;  %1681 = vmatmul.mubr.bf16.vlgmr.msra.gmra.mrb[12].mxu0 %v1163_v63 }
 0x1ae   : > { %1658 = vmatprep.subr.bf16.mxu1 %v2015_v45  ;;  %v1462_v45 = vld [vmem:[%s2354_s5] ss:$0 sm:$0xff] }
 0x1b1   : > { %1659 = vmatpush3.bf16.msra.mxu1 %v1836_v0 }
 0x1b4   : > { %1661 = vmatmul.mubr.bf16.vlgmr.msra.gmra.mrb[8].mxu1 %v1031_v44 }
 0x260   : > { %v1003_v32 = vpop.f32.mrb[8].mxu0 }
 0x261   : > { %v1642_v1 = vpop.f32.mrb[9].mxu0 }
 0x262   : > { %v1006_v2 = vpop.f32.mrb[10].mxu0 }
 0x263   : > { %v1643_v3 = vpop.f32.mrb[11].mxu0 }
 0x267   : > { %v914_v4 = vpop.f32.mrb[4].mxu1 }
 0x268   : > { %v1004_v5 = vadd.f32 %v1003_v32, %v914_v4  ;;  %v1622_v6 = vpop.f32.mrb[5].mxu1 }
 0x269   : > { %v917_v7 = vpop.f32.mrb[6].mxu1 }
 0x26a   : > { %v1007_v8 = vadd.f32 %v1006_v2, %v917_v7  ;;  %v1623_v9 = vpop.f32.mrb[7].mxu1 }
 0x280   : > { %v1247_v35 = vpop.f32.mrb[12].mxu0 }
 0x281   : > { %v1682_v10 = vpop.f32.mrb[13].mxu0  ;;  %v1248_v21 = vadd.f32 %v1463_v16, %v1247_v35 }
 0x282   : > { %v1250_v11 = vpop.f32.mrb[14].mxu0 }
 0x283   : > { %v1683_v12 = vpop.f32.mrb[15].mxu0  ;;  %v1251_v27 = vadd.f32 %v1463_v16, %v1250_v11 }
 0x287   : > { %v1115_v13 = vpop.f32.mrb[8].mxu1 }
 0x288   : > { %v1122_v14 = vadd.f32 %v1115_v13, %v1004_v5  ;;  %v1662_v15 = vpop.f32.mrb[9].mxu1 }
 0x289   : > { %v1118_v17 = vpop.f32.mrb[10].mxu1 }
 0x28a   : > { %v1131_v18 = vadd.f32 %v1462_v45, %v1122_v14  ;;  %v1123_v19 = vadd.f32 %v1118_v17, %v1007_v8  ;;  %v1663_v20 = vpop.f32.mrb[11].mxu1 }
 0x28c   : > { %v1135_v22 = vmul.f32 0.01, %v1131_v18  ;;  %v1132_v23 = vadd.f32 %v1462_v45, %v1123_v19  ;;  %vm1133_vm10 = vcmp.gt.f32.partialorder %v1131_v18, 0.0 }
 0x28e   : > { %v1136_v24 = vmul.f32 0.01, %v1132_v23  ;;  %v1137_v25 = vsel %vm1133_vm10, %v1131_v18, %v1135_v22  ;;  %vm1134_vm11 = vcmp.gt.f32.partialorder %v1132_v23, 0.0 }
 0x28f   : > { %v1254_v26 = vadd.f32 %v1248_v21, %v1137_v25 }
 0x290   : > { %v1138_v28 = vsel %vm1134_vm11, %v1132_v23, %v1136_v24 }
 0x291   : > { %vm1256_vm12 = vcmp.gt.f32.partialorder %v1254_v26, 0.0  ;;  %v1258_v29 = vmul.f32 0.01, %v1254_v26  ;;  %v1255_v30 = vadd.f32 %v1251_v27, %v1138_v28 }
 0x293   : > { %v1260_v31 = vsel %vm1256_vm12, %v1254_v26, %v1258_v29  ;;  %vm1257_vm13 = vcmp.gt.f32.partialorder %v1255_v30, 0.0  ;;  %v1259_v33 = vmul.f32 0.01, %v1255_v30 }
 0x294   : > { %1262 = vst [vmem:[%s339_s20] sm:$0xff] %v1260_v31 }
 0x295   : > { %v1261_v34 = vsel %vm1257_vm13, %v1255_v30, %v1259_v33 }
 0x296   : > { %1263 = vst [vmem:[%s339_s20 + $0x8] sm:$0xff] %v1261_v34 }
 0x297   : > { %1935 = shalt.err (!%p1932_p6)
}
 0x298   : > { %s1936_s23 = scalar_lea.hbm %s2299_s15, 256  ;;  %s1940_s18 = scalar_lea.hbm %s2356_s7, 512 }
 0x299   : > { %p1937_p7 = scmp.ne.s32.totalorder %s2299_s15, %s1936_s23  ;;  %p1941_p4 = scmp.lt.u32.totalorder %s2299_s15, %s2356_s7 }
 0x29a   : > { %p1942_p1 = scmp.lt.u32.totalorder %s1940_s18, %s1936_s23  ;;  %p1944_p8 = scmp.lt.u32.totalorder %s1936_s23, %s2299_s15 }
 0x29b   : > { %p1938_p9 = pnand %p1937_p7, %p2378_p10 }
 0x29c   : > { %p1943_p13 = por %p1942_p1, %p1941_p4 }
 0x29d   : > { %p1939_p12 = pneg %p1938_p9 }
 0x29e   : > { %p1945_p11 = por %p1944_p8, %p1943_p13 }
 0x2a0   : > { %p1946_p0 = pnand %p1945_p11, %p1939_p12 }
 0x2a2   : > { %1949 = shalt.err (!%p1946_p0)
}
 0x2a3   : > { %s2019_s10 = smov 128   ;;  %s2020_s17 = smov 8  }
 0x2a4   : > { %1697 = dma.vmem_to_hbm [thread:$0]  (%p2378_p10), %s2294_s9, 256, %s2299_s15, %s2303_s27, %s2019_s10, %s2019_s10, %s2020_s17  }
 0x2a5 PF: > { %p1719_p2 = scmp.ge.s32.totalorder %s2008_s29, 2  ;;  %s1295_s20 = sand.u32 1, %s1988_s24  }
 0x2a6   : > { %p2379_p3 = scmp.ne.s32.totalorder %s2369_s13, 0  ;;  %s1296_s21 = scalar_lea.sflag [#allocation4], %s1295_s20 }
 0x2a8   : > { %p1710_p5 = pnand %p1719_p2, %p2379_p3 }
 0x2aa   : > { %1983 = dma.done.wait (!%p1710_p5), %s1296_s21, 256  }
 0x2ab   : > { %1985 = vsyncadd (!%p1710_p5), %s1296_s21, 4294967040  ;;  %s22_s29 = sadd.s32 1, %s2008_s29   ;;  %s2380_s2 = sld [smem:[#allocation12_spill]] }
 0x2ac   : > { %p19_p6 = scmp.ge.s32.totalorder %s22_s29, 4   ;;  %s2381_s26 = sld [smem:[#allocation15_spill]] }
 0x2ad   : > { %s2382_s27 = sld [smem:[#allocation13_spill]]  ;;  %s2383_s28 = sld [smem:[#allocation14_spill]] }
 0x2ae   : > { %s2384_s24 = smov %s1992_s25  ;;  %21 = sbr.rel (!%p19_p6) target bundleno = 8 (0x8), region = 100 }
 0x2b1   : > { %s2385_s25 = smov %s2380_s2 }
 0x2b5   :  { %1301 = vsyncpa [#allocation3], 1 }
 0x2b6   :  { %1303 = vsyncpa [#allocation3 + $0x1], 1 }
 0x2b7   :  { %1304 = vsyncpa [#allocation6], 1 }
 0x2b8   :  { %1305 = vsyncpa [#allocation4], 1 }
 0x2b9   :  { %1307 = vsyncpa [#allocation4 + $0x1], 1 }

</bundles_post_ra>
